<compile_context>
chip_gen: v5e
topology: v5e:2x2
jax: 0.10.0
libtpu: 0.0.40
codegen_flags: <defaults>
</compile_context>

<pallas_src>
import math

import jax
import jax.numpy as jnp
from jax import lax
from jax.experimental import pallas as pl
from jax.experimental.pallas import tpu as pltpu

B = 2        # batch size
G = 2        # max graphs per batch item
N = 8        # nodes per graph (== sublane count, so (BG, N, D) reshape is free)
F_IN = 64    # node_feature (32) concat node_type_feature (32)
D = 128      # ent_with_type_size (GAT / attention output dim)
SEQ = 16     # seq_len
LEAKY = 0.2  # GAT leaky-relu slope
BG = B * G
BGN = BG * N
D_EXT = D + 128               # W columns + [W@a_l^T, W@a_r^T, 0-pad], lane-aligned
INV_SQRT_D = 1.0 / math.sqrt(D)


def gat_type_kernel(tbl_ref,                  # SMEM: (BG*3,) int32 [start, end, valid] per graph
                    x_ref, adj_ref, q_ref,    # VMEM whole-array inputs
                    wext_ref,                 # VMEM: (F_IN, D_EXT) bf16, W with el/er cols folded in
                    out_ref):                 # VMEM: (B, SEQ, D) f32 output
    # --- batched single-head GAT over the block-diagonal "batched graph" ---
    # One (BGN, F_IN) x (F_IN, D_EXT) bf16 MXU matmul computes Wh AND both
    # attention projections (extra MXU columns are free at M=32).
    whe = jnp.dot(x_ref[...], wext_ref[...],
                  preferred_element_type=jnp.float32)          # (BGN, D_EXT) f32
    wh = whe[:, :D]                                            # (BGN, D)
    el = whe[:, D:D + 1]                                       # (BGN, 1)
    er = whe[:, D + 1:D + 2]                                    # (BGN, 1)

    e = el + er.T                                              # (BGN, BGN)
    e = jnp.where(e > 0, e, LEAKY * e)                         # leaky relu
    e = jnp.where(adj_ref[...] > 0, e, -1e30)                  # mask non-edges & cross-graph
    e = e - jnp.max(e, axis=-1, keepdims=True)
    pe = jnp.exp(e)
    inv_row = pl.reciprocal(jnp.sum(pe, axis=-1, keepdims=True), approx=True)
    alpha = pe * inv_row                                       # row softmax
    # Neighbourhood mixing for all graphs at once (bf16 MXU, f32 accumulate).
    ft = jnp.dot(alpha.astype(jnp.bfloat16), wh.astype(jnp.bfloat16),
                 preferred_element_type=jnp.float32)           # (BGN, D) == g.ndata['ft']

    # --- query attention, batched over all BG graphs in one pass ---
    ft3 = ft.reshape(BG, N, D)                                 # free layout split (N == 8 sublanes)
    s = jnp.sum(q_ref[...] * ft3, axis=-1, keepdims=True) * INV_SQRT_D   # (BG, N, 1)
    s = s - jnp.max(s, axis=1, keepdims=True)
    p = jnp.exp(s)
    inv_p = pl.reciprocal(jnp.sum(p, axis=1, keepdims=True), approx=True)
    ao = jnp.sum((p * inv_p) * ft3, axis=1, keepdims=True)     # (BG, 1, D)

    # --- span scatter: each out_ref[b] written exactly once (no zero-init / RMW) ---
    pos = lax.broadcasted_iota(jnp.int32, (SEQ, 1), 0)
    for b in range(B):
        acc = None
        for g in range(G):
            bg = b * G + g
            start = tbl_ref[3 * bg + 0]
            end = tbl_ref[3 * bg + 1]
            valid = tbl_ref[3 * bg + 2]
            # Graph validity folded into the mask: padded graphs contribute zeros.
            mask = (pos >= start) & (pos <= end) & (valid > 0)            # (SEQ, 1)
            contrib = jnp.where(mask, ao[bg], 0.0)                        # (SEQ, D), lane-dense
            acc = contrib if acc is None else acc + contrib
        out_ref[b] = acc


def gat_with_type(x, adj, query, spans, ngraphs, w, a_l, a_r):
    # Host-side layout prep (cheap XLA ops, outside the kernel):
    #  - stack all graphs' nodes (== dgl.batch):       (B, G, N, F_IN) -> (BGN, F_IN), bf16 MXU operand
    #  - block-diagonal adjacency (== dgl.batch):      (B, G, N, N)    -> (BGN, BGN)
    #  - fold a_l / a_r into W as extra columns, lane-padded to a multiple of 128
    #  - pack spans + graph-validity into one flat int32 SMEM table
    x_flat = x.reshape(BGN, F_IN).astype(jnp.bfloat16)
    adj_bd = (jnp.einsum('pq,pij->piqj', jnp.eye(BG, dtype=adj.dtype),
                         adj.reshape(BG, N, N))
              .reshape(BGN, BGN))
    q_flat = query.reshape(BG, 1, D)
    w_ext = jnp.concatenate(
        [w, w @ a_l.T, w @ a_r.T,
         jnp.zeros((F_IN, D_EXT - D - 2), jnp.float32)], axis=1).astype(jnp.bfloat16)
    valid = (jnp.arange(G, dtype=jnp.int32)[None, :]
             < ngraphs.astype(jnp.int32)[:, None]).astype(jnp.int32)
    tbl = jnp.concatenate(
        [spans.reshape(BG, 2).astype(jnp.int32), valid.reshape(BG, 1)],
        axis=1).reshape(-1)                                    # (BG*3,) 1D -> no SMEM 2D padding

    smem = pl.BlockSpec(memory_space=pltpu.MemorySpace.SMEM)
    vmem = pl.BlockSpec(memory_space=pltpu.MemorySpace.VMEM)

    # Gridless single invocation: total input footprint is < 100 KB, so whole
    # arrays sit in VMEM with zero per-grid-step pipeline overhead.
    kernel = pl.pallas_call(
        gat_type_kernel,
        out_shape=jax.ShapeDtypeStruct((B, SEQ, D), jnp.float32),
        in_specs=[smem, vmem, vmem, vmem, vmem],
        out_specs=vmem,
    )
    return kernel(tbl, x_flat, adj_bd, q_flat, w_ext)


def reference(x, adj, query, spans, ngraphs, w, a_l, a_r):
    """Pure-JAX f32 reference of the same semantics (exact softmax) for the check."""
    out = jnp.zeros((B, SEQ, D), jnp.float32)
    for b in range(B):
        for g in range(G):
            if g >= int(ngraphs[b]):
                continue
            wh = x[b, g] @ w
            el = (wh * a_l).sum(-1, keepdims=True)
            er = (wh * a_r).sum(-1, keepdims=True)
            e = el + er.T
            e = jnp.where(e > 0, e, LEAKY * e)
            e = jnp.where(adj[b, g] > 0, e, -1e30)
            alpha = jax.nn.softmax(e, axis=-1)
            ft = alpha @ wh
            scores = (query[b, g] @ ft.T) / math.sqrt(D)
            attw = jax.nn.softmax(scores, axis=-1)
            ao = attw @ ft                                   # (1, D)
            s, en = int(spans[b, g, 0]), int(spans[b, g, 1])
            out = out.at[b, s:en + 1].add(jnp.broadcast_to(ao, (en - s + 1, D)))
    return out


if __name__ == "__main__":
    key = jax.random.PRNGKey(0)
    k1, k2, k3, k4, k5, k6 = jax.random.split(key, 6)

    # node_feature (32) and node_type_feature (32), concatenated like the torch code
    node_feat = jax.random.normal(k1, (B, G, N, 32), jnp.float32)
    type_feat = jax.random.normal(k2, (B, G, N, 32), jnp.float32)
    x = jnp.concatenate([node_feat, type_feat], axis=-1)          # (B, G, N, F_IN)

    # random symmetric adjacency with self loops (dense stand-in for the DGL graph)
    a_rand = jax.random.uniform(k3, (B, G, N, N))
    adj = (a_rand > 0.5).astype(jnp.float32)
    adj = jnp.maximum(adj, jnp.transpose(adj, (0, 1, 3, 2)))
    adj = jnp.maximum(adj, jnp.eye(N, dtype=jnp.float32)[None, None])

    query = jax.random.normal(k4, (B, G, 1, D), jnp.float32)      # query[i, j, :]

    # deterministic GAT parameters
    w = jax.random.normal(k5, (F_IN, D), jnp.float32) * 0.1
    ka, kb = jax.random.split(k6)
    a_l = jax.random.normal(ka, (1, D), jnp.float32) * 0.1
    a_r = jax.random.normal(kb, (1, D), jnp.float32) * 0.1

    # spans (inclusive [start, end]) and #valid graphs per batch item
    spans = jnp.array([[[1, 3], [6, 9]],
                       [[2, 5], [0, 0]]], dtype=jnp.int32)
    ngraphs = jnp.array([2, 1], dtype=jnp.int32)                  # batch 1 has only 1 graph

    out = gat_with_type(x, adj, query, spans, ngraphs, w, a_l, a_r)
    out = jax.block_until_ready(out)

    ref = reference(x, adj, query, spans, ngraphs, w, a_l, a_r)
    assert out.shape == (B, SEQ, D)
    # Tolerance accounts for bf16 MXU operands and the approx EUP reciprocals
    # used in both softmaxes (reference is exact f32).
    assert jnp.allclose(out, ref, atol=3e-2, rtol=2e-2)
    print("KERNEL_OK")
</pallas_src>

<mosaic_0001>
module attributes {stable_mosaic.version = 11 : i64} {
  func.func @gat_type_kernel(%arg0: memref<12xi32, #tpu.memory_space<smem>>, %arg1: memref<32x64xbf16, #tpu.memory_space<vmem>>, %arg2: memref<32x32xf32, #tpu.memory_space<vmem>>, %arg3: memref<4x1x128xf32, #tpu.memory_space<vmem>>, %arg4: memref<64x256xbf16, #tpu.memory_space<vmem>>, %arg5: memref<2x16x128xf32, #tpu.memory_space<vmem>>) attributes {dimension_semantics = [], scalar_prefetch = 0 : i64, scratch_operands = 0 : i64, tpu.core_type = #tpu.core_type<tc>} {
    %c0 = arith.constant 0 : index
    %c0_0 = arith.constant 0 : index
    %0 = vector.load %arg1[%c0, %c0_0] : memref<32x64xbf16, #tpu.memory_space<vmem>>, vector<32x64xbf16>
    %c0_1 = arith.constant 0 : index
    %c0_2 = arith.constant 0 : index
    %1 = vector.load %arg4[%c0_1, %c0_2] : memref<64x256xbf16, #tpu.memory_space<vmem>>, vector<64x256xbf16>
    %cst = arith.constant dense<0.000000e+00> : vector<32x256xf32>
    %2 = tpu.matmul %0, %1, %cst {dimension_numbers = #tpu.dot_dimension_numbers<[1], [0], [0], [1], [0, 0, 1, 1], [], []>} : vector<32x64xbf16>, vector<64x256xbf16>, vector<32x256xf32> -> vector<32x256xf32>
    %3 = vector.extract_strided_slice %2 {offsets = [0, 0], sizes = [32, 128], strides = [1, 1]} : vector<32x256xf32> to vector<32x128xf32>
    %4 = vector.extract_strided_slice %2 {offsets = [0, 128], sizes = [32, 1], strides = [1, 1]} : vector<32x256xf32> to vector<32x1xf32>
    %5 = vector.extract_strided_slice %2 {offsets = [0, 129], sizes = [32, 1], strides = [1, 1]} : vector<32x256xf32> to vector<32x1xf32>
    %6 = tpu.transpose %5, [1, 0] : vector<32x1xf32> -> vector<1x32xf32>
    %7 = vector.broadcast %4 : vector<32x1xf32> to vector<32x32xf32>
    %8 = vector.broadcast %6 : vector<1x32xf32> to vector<32x32xf32>
    %9 = arith.addf %7, %8 : vector<32x32xf32>
    %cst_3 = arith.constant 0.000000e+00 : f32
    %10 = vector.broadcast %cst_3 : f32 to vector<32x32xf32>
    %11 = arith.cmpf ogt, %9, %10 : vector<32x32xf32>
    %cst_4 = arith.constant 2.000000e-01 : f32
    %12 = vector.broadcast %cst_4 : f32 to vector<32x32xf32>
    %13 = arith.mulf %12, %9 : vector<32x32xf32>
    %14 = arith.select %11, %9, %13 : vector<32x32xi1>, vector<32x32xf32>
    %c0_5 = arith.constant 0 : index
    %c0_6 = arith.constant 0 : index
    %15 = vector.load %arg2[%c0_5, %c0_6] : memref<32x32xf32, #tpu.memory_space<vmem>>, vector<32x32xf32>
    %cst_7 = arith.constant 0.000000e+00 : f32
    %16 = vector.broadcast %cst_7 : f32 to vector<32x32xf32>
    %17 = arith.cmpf ogt, %15, %16 : vector<32x32xf32>
    %cst_8 = arith.constant -1.000000e+30 : f32
    %18 = vector.broadcast %cst_8 : f32 to vector<32x32xf32>
    %19 = arith.select %17, %14, %18 : vector<32x32xi1>, vector<32x32xf32>
    %cst_9 = arith.constant dense<0xFF800000> : vector<32xf32>
    %20 = vector.multi_reduction <maximumf>, %19, %cst_9 [1] : vector<32x32xf32> to vector<32xf32>
    %21 = vector.shape_cast %20 : vector<32xf32> to vector<32x1xf32>
    %22 = vector.broadcast %21 : vector<32x1xf32> to vector<32x32xf32>
    %23 = arith.subf %19, %22 : vector<32x32xf32>
    %24 = math.exp %23 : vector<32x32xf32>
    %cst_10 = arith.constant dense<0.000000e+00> : vector<32xf32>
    %25 = vector.multi_reduction <add>, %24, %cst_10 [1] : vector<32x32xf32> to vector<32xf32>
    %26 = vector.shape_cast %25 : vector<32xf32> to vector<32x1xf32>
    %27 = tpu.reciprocal %26 {approx = true} : vector<32x1xf32> -> vector<32x1xf32>
    %28 = vector.broadcast %27 : vector<32x1xf32> to vector<32x32xf32>
    %29 = arith.mulf %24, %28 : vector<32x32xf32>
    %30 = arith.truncf %29 : vector<32x32xf32> to vector<32x32xbf16>
    %31 = arith.truncf %3 : vector<32x128xf32> to vector<32x128xbf16>
    %cst_11 = arith.constant dense<0.000000e+00> : vector<32x128xf32>
    %32 = tpu.matmul %30, %31, %cst_11 {dimension_numbers = #tpu.dot_dimension_numbers<[1], [0], [0], [1], [0, 0, 1, 1], [], []>} : vector<32x32xbf16>, vector<32x128xbf16>, vector<32x128xf32> -> vector<32x128xf32>
    %33 = vector.shape_cast %32 : vector<32x128xf32> to vector<4x8x128xf32>
    %c0_12 = arith.constant 0 : index
    %c0_13 = arith.constant 0 : index
    %c0_14 = arith.constant 0 : index
    %34 = vector.load %arg3[%c0_12, %c0_13, %c0_14] : memref<4x1x128xf32, #tpu.memory_space<vmem>>, vector<4x1x128xf32>
    %35 = vector.broadcast %34 : vector<4x1x128xf32> to vector<4x8x128xf32>
    %36 = arith.mulf %35, %33 : vector<4x8x128xf32>
    %cst_15 = arith.constant dense<0.000000e+00> : vector<4x8xf32>
    %37 = vector.multi_reduction <add>, %36, %cst_15 [2] : vector<4x8x128xf32> to vector<4x8xf32>
    %38 = vector.shape_cast %37 : vector<4x8xf32> to vector<4x8x1xf32>
    %cst_16 = arith.constant 0.0883883461 : f32
    %39 = vector.broadcast %cst_16 : f32 to vector<4x8x1xf32>
    %40 = arith.mulf %38, %39 : vector<4x8x1xf32>
    %cst_17 = arith.constant dense<0xFF800000> : vector<4x1xf32>
    %41 = vector.multi_reduction <maximumf>, %40, %cst_17 [1] : vector<4x8x1xf32> to vector<4x1xf32>
    %42 = vector.shape_cast %41 : vector<4x1xf32> to vector<4x1x1xf32>
    %43 = vector.broadcast %42 : vector<4x1x1xf32> to vector<4x8x1xf32>
    %44 = arith.subf %40, %43 : vector<4x8x1xf32>
    %45 = math.exp %44 : vector<4x8x1xf32>
    %cst_18 = arith.constant dense<0.000000e+00> : vector<4x1xf32>
    %46 = vector.multi_reduction <add>, %45, %cst_18 [1] : vector<4x8x1xf32> to vector<4x1xf32>
    %47 = vector.shape_cast %46 : vector<4x1xf32> to vector<4x1x1xf32>
    %48 = tpu.reciprocal %47 {approx = true} : vector<4x1x1xf32> -> vector<4x1x1xf32>
    %49 = vector.broadcast %48 : vector<4x1x1xf32> to vector<4x8x1xf32>
    %50 = arith.mulf %45, %49 : vector<4x8x1xf32>
    %51 = vector.broadcast %50 : vector<4x8x1xf32> to vector<4x8x128xf32>
    %52 = arith.mulf %51, %33 : vector<4x8x128xf32>
    %cst_19 = arith.constant dense<0.000000e+00> : vector<4x128xf32>
    %53 = vector.multi_reduction <add>, %52, %cst_19 [1] : vector<4x8x128xf32> to vector<4x128xf32>
    %54 = vector.shape_cast %53 : vector<4x128xf32> to vector<4x1x128xf32>
    %55 = tpu.iota {dimensions = array<i32: 0>} : vector<16x1xi32>
    %c0_20 = arith.constant 0 : index
    %56 = memref.load %arg0[%c0_20] : memref<12xi32, #tpu.memory_space<smem>>
    %c1 = arith.constant 1 : index
    %57 = memref.load %arg0[%c1] : memref<12xi32, #tpu.memory_space<smem>>
    %c2 = arith.constant 2 : index
    %58 = memref.load %arg0[%c2] : memref<12xi32, #tpu.memory_space<smem>>
    %59 = vector.broadcast %56 : i32 to vector<16x1xi32>
    %60 = arith.cmpi sge, %55, %59 : vector<16x1xi32>
    %61 = vector.broadcast %57 : i32 to vector<16x1xi32>
    %62 = arith.cmpi sle, %55, %61 : vector<16x1xi32>
    %63 = arith.andi %60, %62 : vector<16x1xi1>
    %c0_i32 = arith.constant 0 : i32
    %64 = arith.cmpi sgt, %58, %c0_i32 : i32
    %65 = vector.broadcast %64 : i1 to vector<16x1xi1>
    %66 = arith.andi %63, %65 : vector<16x1xi1>
    %67 = vector.extract_strided_slice %54 {offsets = [0, 0, 0], sizes = [1, 1, 128], strides = [1, 1, 1]} : vector<4x1x128xf32> to vector<1x1x128xf32>
    %68 = vector.shape_cast %67 : vector<1x1x128xf32> to vector<1x128xf32>
    %cst_21 = arith.constant 0.000000e+00 : f32
    %69 = vector.shape_cast %66 : vector<16x1xi1> to vector<16x1xi1>
    %70 = vector.broadcast %69 : vector<16x1xi1> to vector<16x128xi1>
    %71 = vector.shape_cast %68 : vector<1x128xf32> to vector<1x128xf32>
    %72 = vector.broadcast %71 : vector<1x128xf32> to vector<16x128xf32>
    %73 = vector.broadcast %cst_21 : f32 to vector<16x128xf32>
    %74 = arith.select %70, %72, %73 : vector<16x128xi1>, vector<16x128xf32>
    %c3 = arith.constant 3 : index
    %75 = memref.load %arg0[%c3] : memref<12xi32, #tpu.memory_space<smem>>
    %c4 = arith.constant 4 : index
    %76 = memref.load %arg0[%c4] : memref<12xi32, #tpu.memory_space<smem>>
    %c5 = arith.constant 5 : index
    %77 = memref.load %arg0[%c5] : memref<12xi32, #tpu.memory_space<smem>>
    %78 = vector.broadcast %75 : i32 to vector<16x1xi32>
    %79 = arith.cmpi sge, %55, %78 : vector<16x1xi32>
    %80 = vector.broadcast %76 : i32 to vector<16x1xi32>
    %81 = arith.cmpi sle, %55, %80 : vector<16x1xi32>
    %82 = arith.andi %79, %81 : vector<16x1xi1>
    %c0_i32_22 = arith.constant 0 : i32
    %83 = arith.cmpi sgt, %77, %c0_i32_22 : i32
    %84 = vector.broadcast %83 : i1 to vector<16x1xi1>
    %85 = arith.andi %82, %84 : vector<16x1xi1>
    %86 = vector.extract_strided_slice %54 {offsets = [1, 0, 0], sizes = [1, 1, 128], strides = [1, 1, 1]} : vector<4x1x128xf32> to vector<1x1x128xf32>
    %87 = vector.shape_cast %86 : vector<1x1x128xf32> to vector<1x128xf32>
    %cst_23 = arith.constant 0.000000e+00 : f32
    %88 = vector.shape_cast %85 : vector<16x1xi1> to vector<16x1xi1>
    %89 = vector.broadcast %88 : vector<16x1xi1> to vector<16x128xi1>
    %90 = vector.shape_cast %87 : vector<1x128xf32> to vector<1x128xf32>
    %91 = vector.broadcast %90 : vector<1x128xf32> to vector<16x128xf32>
    %92 = vector.broadcast %cst_23 : f32 to vector<16x128xf32>
    %93 = arith.select %89, %91, %92 : vector<16x128xi1>, vector<16x128xf32>
    %94 = arith.addf %74, %93 : vector<16x128xf32>
    %c0_24 = arith.constant 0 : index
    %c0_25 = arith.constant 0 : index
    %c0_26 = arith.constant 0 : index
    %95 = vector.load %arg5[%c0_24, %c0_25, %c0_26] : memref<2x16x128xf32, #tpu.memory_space<vmem>>, vector<1x16x128xf32>
    %96 = vector.shape_cast %95 : vector<1x16x128xf32> to vector<16x128xf32>
    %97 = vector.shape_cast %94 : vector<16x128xf32> to vector<1x16x128xf32>
    tpu.vector_store %arg5[%c0_24, %c0_25, %c0_26], %97 {strides = array<i32>} : memref<2x16x128xf32, #tpu.memory_space<vmem>>, vector<1x16x128xf32>,
    %c6 = arith.constant 6 : index
    %98 = memref.load %arg0[%c6] : memref<12xi32, #tpu.memory_space<smem>>
    %c7 = arith.constant 7 : index
    %99 = memref.load %arg0[%c7] : memref<12xi32, #tpu.memory_space<smem>>
    %c8 = arith.constant 8 : index
    %100 = memref.load %arg0[%c8] : memref<12xi32, #tpu.memory_space<smem>>
    %101 = vector.broadcast %98 : i32 to vector<16x1xi32>
    %102 = arith.cmpi sge, %55, %101 : vector<16x1xi32>
    %103 = vector.broadcast %99 : i32 to vector<16x1xi32>
    %104 = arith.cmpi sle, %55, %103 : vector<16x1xi32>
    %105 = arith.andi %102, %104 : vector<16x1xi1>
    %c0_i32_27 = arith.constant 0 : i32
    %106 = arith.cmpi sgt, %100, %c0_i32_27 : i32
    %107 = vector.broadcast %106 : i1 to vector<16x1xi1>
    %108 = arith.andi %105, %107 : vector<16x1xi1>
    %109 = vector.extract_strided_slice %54 {offsets = [2, 0, 0], sizes = [1, 1, 128], strides = [1, 1, 1]} : vector<4x1x128xf32> to vector<1x1x128xf32>
    %110 = vector.shape_cast %109 : vector<1x1x128xf32> to vector<1x128xf32>
    %cst_28 = arith.constant 0.000000e+00 : f32
    %111 = vector.shape_cast %108 : vector<16x1xi1> to vector<16x1xi1>
    %112 = vector.broadcast %111 : vector<16x1xi1> to vector<16x128xi1>
    %113 = vector.shape_cast %110 : vector<1x128xf32> to vector<1x128xf32>
    %114 = vector.broadcast %113 : vector<1x128xf32> to vector<16x128xf32>
    %115 = vector.broadcast %cst_28 : f32 to vector<16x128xf32>
    %116 = arith.select %112, %114, %115 : vector<16x128xi1>, vector<16x128xf32>
    %c9 = arith.constant 9 : index
    %117 = memref.load %arg0[%c9] : memref<12xi32, #tpu.memory_space<smem>>
    %c10 = arith.constant 10 : index
    %118 = memref.load %arg0[%c10] : memref<12xi32, #tpu.memory_space<smem>>
    %c11 = arith.constant 11 : index
    %119 = memref.load %arg0[%c11] : memref<12xi32, #tpu.memory_space<smem>>
    %120 = vector.broadcast %117 : i32 to vector<16x1xi32>
    %121 = arith.cmpi sge, %55, %120 : vector<16x1xi32>
    %122 = vector.broadcast %118 : i32 to vector<16x1xi32>
    %123 = arith.cmpi sle, %55, %122 : vector<16x1xi32>
    %124 = arith.andi %121, %123 : vector<16x1xi1>
    %c0_i32_29 = arith.constant 0 : i32
    %125 = arith.cmpi sgt, %119, %c0_i32_29 : i32
    %126 = vector.broadcast %125 : i1 to vector<16x1xi1>
    %127 = arith.andi %124, %126 : vector<16x1xi1>
    %128 = vector.extract_strided_slice %54 {offsets = [3, 0, 0], sizes = [1, 1, 128], strides = [1, 1, 1]} : vector<4x1x128xf32> to vector<1x1x128xf32>
    %129 = vector.shape_cast %128 : vector<1x1x128xf32> to vector<1x128xf32>
    %cst_30 = arith.constant 0.000000e+00 : f32
    %130 = vector.shape_cast %127 : vector<16x1xi1> to vector<16x1xi1>
    %131 = vector.broadcast %130 : vector<16x1xi1> to vector<16x128xi1>
    %132 = vector.shape_cast %129 : vector<1x128xf32> to vector<1x128xf32>
    %133 = vector.broadcast %132 : vector<1x128xf32> to vector<16x128xf32>
    %134 = vector.broadcast %cst_30 : f32 to vector<16x128xf32>
    %135 = arith.select %131, %133, %134 : vector<16x128xi1>, vector<16x128xf32>
    %136 = arith.addf %116, %135 : vector<16x128xf32>
    %c1_31 = arith.constant 1 : index
    %c0_32 = arith.constant 0 : index
    %c0_33 = arith.constant 0 : index
    %137 = vector.load %arg5[%c1_31, %c0_32, %c0_33] : memref<2x16x128xf32, #tpu.memory_space<vmem>>, vector<1x16x128xf32>
    %138 = vector.shape_cast %137 : vector<1x16x128xf32> to vector<16x128xf32>
    %139 = vector.shape_cast %136 : vector<16x128xf32> to vector<1x16x128xf32>
    tpu.vector_store %arg5[%c1_31, %c0_32, %c0_33], %139 {strides = array<i32>} : memref<2x16x128xf32, #tpu.memory_space<vmem>>, vector<1x16x128xf32>,
    return
  }
}

</mosaic_0001>

<bundles_post_ra>
// kernel: tpu_custom_call.1
= control target key start
LH: loop header
LB: loop body
LE: loop exit
PB: predicated region body
PF: predicated region fallthrough
CT: control target
= control target key end

     0   :  { %10 = vsyncpa [#allocation5], 0  ;;  %s1190_s0 = inlined_call_operand.hbm [shape: s32[12], index: 0, kind: input, shape index: {}]   ;;  %s1191_s1 = inlined_call_operand.hbm [shape: bf16[32,64], index: 1, kind: input, shape index: {}]   ;;  %s1192_s2 = inlined_call_operand.hbm [shape: f32[32,32], index: 2, kind: input, shape index: {}]   ;;  %s1193_s3 = inlined_call_operand.hbm [shape: f32[4,1,128], index: 3, kind: input, shape index: {}]   ;;  %s1194_s4 = inlined_call_operand.hbm [shape: bf16[64,256], index: 4, kind: input, shape index: {}]   ;;  %s1195_s5 = inlined_call_operand.hbm [shape: f32[2,16,128], index: 5, kind: output, shape index: {}]  }
   0x1   :  { %11 = vsyncpa [#allocation3], 0 }
   0x2   :  { %12 = vsyncpa [#allocation8], 0 }
   0x3   :  { %13 = vsyncpa [#allocation11], 0  ;;  %s41_s20 = sshll.u32 %s1192_s2, 4  ;;  %s42_s20 = int_to_ptr.hbm [resolvable:$true] %s41_s20 }
   0x4   :  { %14 = vsyncpa [#allocation4], 0  ;;  %s893_s21 = smov [#allocation7]   ;;  %s20_s25 = sshll.u32 %s1190_s0, 4  ;;  %s21_s25 = int_to_ptr.hbm [resolvable:$true] %s20_s25 }
   0x5   :  { %s43_s22 = sshll.u32 %s893_s21, 4  ;;  %s894_s26 = smov 128   ;;  %s44_s22 = int_to_ptr.vmem [resolvable:$true] %s43_s22 }
   0x6   :  { %s895_s27 = smov 8   ;;  %s896_s28 = smov [#allocation2]  }
   0x7   :  { %49 = dma.hbm_to_vmem [thread:$0]  %s42_s20, 512, %s44_s22, [#allocation8], %s894_s26, %s894_s26, %s895_s27  }
   0x8   :  { %23 = dma.hbm_to_smem %s21_s25, 16, %s896_s28, [#allocation5]  }
   0x9   :  { %s28_s30 = sshll.u32 %s1191_s1, 4  ;;  %s897_s6 = smov [#allocation6]   ;;  %s29_s30 = int_to_ptr.hbm [resolvable:$true] %s28_s30 }
   0xa   :  { %s30_s7 = sshll.u32 %s897_s6, 4  ;;  %s54_s0 = sshll.u32 %s1193_s3, 4  ;;  %s31_s7 = int_to_ptr.vmem [resolvable:$true] %s30_s7  ;;  %s55_s0 = int_to_ptr.hbm [resolvable:$true] %s54_s0 }
   0xb   :  { %s898_s10 = smov 64   ;;  %s899_s11 = smov 4  }
   0xc   :  { %36 = dma.hbm_to_vmem [thread:$0]  %s29_s30, 256, %s31_s7, [#allocation3], %s898_s10, %s898_s10, %s899_s11  }
   0xd   :  { %s900_s12 = smov [#allocation9]   ;;  %s901_s14 = smov 16  }
   0xe   :  { %s56_s13 = sshll.u32 %s900_s12, 4  ;;  %s902_s15 = smov 1   ;;  %s57_s13 = int_to_ptr.vmem [resolvable:$true] %s56_s13 }
   0xf   :  { %62 = dma.hbm_to_vmem [thread:$0]  %s55_s0, 64, %s57_s13, [#allocation8], %s901_s14, %s901_s14, %s902_s15  }
  0x10   :  { %s67_s17 = sshll.u32 %s1194_s4, 4  ;;  %s903_s18 = smov [#allocation10]   ;;  %s68_s17 = int_to_ptr.hbm [resolvable:$true] %s67_s17 }
  0x11   :  { %s69_s19 = sshll.u32 %s903_s18, 4  ;;  %s70_s19 = int_to_ptr.vmem [resolvable:$true] %s69_s19 }
  0x12   :  { %75 = dma.hbm_to_vmem [thread:$0]  %s68_s17, 1024, %s70_s19, [#allocation11], %s894_s26, %s894_s26, %s895_s27  }
  0x13   :  { %883 = dma.done.wait [#allocation5], 16  }
  0x14   :  { %884 = vsyncadd [#allocation5], 4294967280 }
  0x15   :  { %885 = dma.done.wait [#allocation3], 256  }
  0x16   :  { %886 = vsyncadd [#allocation3], 4294967040 }
  0x17   :  { %887 = dma.done.wait [#allocation8], 576  }
  0x18   :  { %888 = vsyncadd [#allocation8], 4294966720 }
  0x19   :  { %889 = dma.done.wait [#allocation11], 1024  }
  0x1a   :  { %890 = vsyncadd [#allocation11], 4294966272 }
  0x1b   :  { %96 = sfence }
  0x1c   :  { %v691_v0 = vld [vmem:[#allocation10 + $0x34] sm:$0xf]  ;;  %v662_v1 = vld [vmem:[#allocation10 + $0x38] sm:$0xf0]  ;;  %v689_v2 = vld [vmem:[#allocation10 + $0x24] sm:$0xf] }
  0x1d   :  { %v665_v3 = vor.u32 %v691_v0, %v662_v1  ;;  %v654_v4 = vld [vmem:[#allocation10 + $0x28] sm:$0xf0]  ;;  %v687_v5 = vld [vmem:[#allocation10 + $0x14] sm:$0xf]  ;;  %v646_v7 = vld [vmem:[#allocation10 + $0x18] sm:$0xf0] }
  0x1e   :  { %v657_v6 = vor.u32 %v689_v2, %v654_v4  ;;  %v904_v8 = vmov 0   ;;  %v649_v9 = vor.u32 %v687_v5, %v646_v7  ;;  %v685_v10 = vld [vmem:[#allocation10 + $0x4] sm:$0xf]  ;;  %v638_v11 = vld [vmem:[#allocation10 + $0x8] sm:$0xf0]  ;;  %vm160_vm0 = vcmask 523264  }
  0x1f   :  { %190 = vmatpush.bf16.msra.mxu1 %v665_v3  ;;  %712 = vset.pattern.permute.xlu2 %v904_v8  ;;  %v641_v12 = vor.u32 %v685_v10, %v638_v11  ;;  %v683_v13 = vld [vmem:[#allocation6] sm:$0xff]  ;;  %v684_v14 = vld [vmem:[#allocation6 + $0x8] sm:$0xff]  ;;  %s905_s3 = smov 127   ;;  %v652_v26 = vld [vmem:[#allocation10 + $0x20] sm:$0xf]  ;;  %vm298_vm5 = vcmask 261120  }
  0x20   :  { %713 = vset.pattern.permute.xlu0 %v904_v8  ;;  %714 = vset.pattern.permute.xlu1 %v904_v8  ;;  %v660_v24 = vld [vmem:[#allocation10 + $0x30] sm:$0xf]  ;;  %v692_v25 = vld [vmem:[#allocation10 + $0x34] sm:$0xf0]  ;;  %v690_v28 = vld [vmem:[#allocation10 + $0x24] sm:$0xf0] }
  0x21   :  { %v661_v27 = vor.u32 %v692_v25, %v660_v24  ;;  %v653_v29 = vor.u32 %v690_v28, %v652_v26  ;;  %v644_v30 = vld [vmem:[#allocation10 + $0x10] sm:$0xf]  ;;  %v688_v31 = vld [vmem:[#allocation10 + $0x14] sm:$0xf0]  ;;  %v636_v34 = vld [vmem:[#allocation10] sm:$0xf] }
  0x22   :  { %v645_v33 = vor.u32 %v688_v31, %v644_v30  ;;  %v686_v35 = vld [vmem:[#allocation10 + $0x4] sm:$0xf0]  ;;  %v286_v40 = vld [vmem:[#allocation7] sm:$0xff]  ;;  %v288_v52 = vld [vmem:[#allocation7 + $0x10] sm:$0xff]  ;;  %s673_s4 = sld [smem:[#allocation2 + $0x2]]  ;;  %s906_s10 = smov [#allocation12]  }
  0x23   :  { %191 = vmatpush.bf16.msra.mxu1 %v657_v6  ;;  %693 = vmatpush.bf16.msra.mxu3 %v661_v27  ;;  %v637_v36 = vor.u32 %v686_v35, %v636_v34  ;;  %v287_v39 = vld [vmem:[#allocation7 + $0x8] sm:$0xff]  ;;  %vm290_vm2 = vcmp.gt.f32.partialorder %v286_v40, 0.0  ;;  %v289_v54 = vld [vmem:[#allocation7 + $0x18] sm:$0xff]  ;;  %vm292_vm8 = vcmp.gt.f32.partialorder %v288_v52, 0.0  ;;  %s987_s20 = sld [smem:[#allocation2]]  ;;  %s608_s11 = sshll.u32 %s906_s10, 4  ;;  %s609_s11 = int_to_ptr.vmem [resolvable:$true] %s608_s11 }
  0x24   :  { %171 = vmatpush.bf16.msra.mxu0 %v661_v27  ;;  %vm291_vm1 = vcmp.gt.f32.partialorder %v287_v39, 0.0  ;;  %vm293_vm9 = vcmp.gt.f32.partialorder %v289_v54, 0.0  ;;  %s989_s21 = sld [smem:[#allocation2 + $0x5]]  ;;  %s610_s14 = sshll.u32 %s1195_s5, 4  ;;  %s611_s14 = int_to_ptr.hbm [resolvable:$true] %s610_s14 }
  0x25   :  { %s992_s22 = sld [smem:[#allocation2 + $0x1]] }
  0x26   :  { %s995_s23 = sld [smem:[#allocation2 + $0x3]] }
  0x27   :  { %192 = vmatpush.bf16.msra.mxu1 %v649_v9  ;;  %694 = vmatpush.bf16.msra.mxu3 %v653_v29  ;;  %s997_s24 = sld [smem:[#allocation2 + $0x4]] }
  0x28   :  { %172 = vmatpush.bf16.msra.mxu0 %v653_v29  ;;  %p514_p0 = scmp.gt.s32.totalorder %s673_s4, 0  ;;  %s1011_s28 = sld [smem:[#allocation2 + $0x8]] }
  0x29   :  { %s1046_s2 = sld [smem:[#allocation2 + $0x6]] }
  0x2a   :  { %s515_s25 = scalar_select %p514_p0, 1, 0 }
  0x2b   :  { %193 = vmatpush.bf16.msra.mxu1 %v641_v12  ;;  %695 = vmatpush.bf16.msra.mxu3 %v645_v33  ;;  %p537_p1 = scmp.gt.s32.totalorder %s989_s21, 0  ;;  %s1058_s30 = sld [smem:[#allocation2 + $0xb]] }
  0x2c   :  { %173 = vmatpush.bf16.msra.mxu0 %v645_v33  ;;  %s1074_s6 = sld [smem:[#allocation2 + $0x7]] }
  0x2d   :  { %s538_s29 = scalar_select %p537_p1, 1, 0 }
  0x2e   :  { %668 = vmatmul.msk.bf16.vlgmr.msra.gmra.mxu1 %vm160_vm0, %v683_v13  ;;  %p564_p2 = scmp.gt.s32.totalorder %s1011_s28, 0  ;;  %s1098_s7 = sld [smem:[#allocation2 + $0x9]] }
  0x2f   :  { %696 = vmatpush.bf16.msra.mxu3 %v637_v36  ;;  %s1111_s8 = sld [smem:[#allocation2 + $0xa]] }
  0x30   :  { %174 = vmatpush.bf16.msra.mxu0 %v637_v36  ;;  %s565_s9 = scalar_select %p564_p2, 1, 0 }
  0x31   :  { %p587_p3 = scmp.gt.s32.totalorder %s1058_s30, 0 }
  0x32   :  { %667 = vmatmul.msk.bf16.vlgmr.msra.gmra.mxu3 %vm160_vm0, %v684_v14 }
  0x33   :  { %666 = vmatmul.msk.bf16.vlgmr.msra.gmra.mxu0 %vm160_vm0, %v683_v13  ;;  %s588_s0 = scalar_select %p587_p3, 1, 0 }
  0x3e   :  { %669 = vmatmul.msk.bf16.gmra.mxu1 %vm160_vm0, %v684_v14 }
  0xab   :  { %v195_v15 = vpop.f32.mrf.mxu1 }
  0xac   :  { %254 = vperm.xlu2 %712, %v195_v15   ;;  %209 = vrot.lane.b32.xlu0 %v195_v15, %s905_s3 }
  0xb0   :  { %v176_v7 = vpop.f32.mrf.mxu0 }
  0xb3   :  { %v197_v16 = vpop.f32.mrf.mxu1 }
  0xb4   :  { %258 = vperm.xlu2 %712, %v197_v16   ;;  %211 = vrot.lane.b32.xlu0 %v197_v16, %s905_s3 }
  0xb5   :  { %v181_v12 = vpop.f32.mrf.mxu3 }
  0xbb   :  { %v200_v17 = vpop.f32.mrf.mxu1 }
  0xbc   :  { %262 = vperm.xlu0 %713, %v200_v17   ;;  %213 = vrot.lane.b32.xlu1 %v200_v17, %s905_s3 }
  0xc3   :  { %v202_v18 = vpop.f32.mrf.mxu1 }
  0xc4   :  { %215 = vrot.lane.b32.xlu1 %v202_v18, %s905_s3 }
  0xcc   :  { %266 = vperm.xlu1 %714, %v202_v18  }
 0x106   :  { %v255_v23 = vpop.permute.xlu2 %254 }
 0x10e   :  { %v259_v32 = vpop.permute.xlu2 %258 }
 0x11e   :  { %v210_v19 = vpop.permute.xlu0 %209 }
 0x11f   :  { %221 = vxpose.xlu2.b32.start [1/4] (short) (narrow) %v210_v19, 8  ;;  %v183_v19 = vpop.f32.mrf.mxu3 }
 0x126   :  { %v212_v20 = vpop.permute.xlu0 %211 }
 0x127   :  { %222 = vxpose.xlu2.b32.cont [2/4] (short) (narrow) %v212_v20, 8  ;;  %v178_v20 = vpop.f32.mrf.mxu0 }
 0x128   :  { %v345_v26 = vpack.c.bf16 %v178_v20, %v176_v7 }
 0x12e   :  { %v214_v21 = vpop.permute.xlu1 %213  ;;  %v263_v41 = vpop.permute.xlu0 %262 }
 0x12f   :  { %223 = vxpose.xlu2.b32.cont [3/4] (short) (narrow) %v214_v21, 8 }
 0x136   :  { %v216_v22 = vpop.permute.xlu1 %215 }
 0x137   :  { %224 = vxpose.xlu2.b32.end [4/4] (short) (narrow) %v216_v22, 8  ;;  %v346_v22 = vpack.c.bf16 %v183_v19, %v181_v12 }
 0x139   :  { %359 = vmatpush.bf16.msra.mxu2 %v346_v22 }
 0x13d   :  { %360 = vmatpush.bf16.msra.mxu2 %v345_v26 }
 0x13e   :  { %v267_v42 = vpop.permute.xlu1 %266 }
 0x1b8   :  { %v237_v37 = vpop.trf.xlu2 }
 0x1b9   :  { %v269_v38 = vperm.slane %v237_v37, 0 }
 0x1bb   :  { %v271_v43 = vadd.f32 %v269_v38, %v259_v32  ;;  %v270_v44 = vadd.f32 %v269_v38, %v255_v23  ;;  %v272_v45 = vadd.f32 %v269_v38, %v263_v41  ;;  %v273_v46 = vadd.f32 %v269_v38, %v267_v42  ;;  %v715_v41 = vld [vmem:[#allocation9] ss:$0 sm:$0xff] }
 0x1bd   :  { %vm275_vm3 = vcmp.gt.f32.partialorder %v271_v43, 0.0  ;;  %v279_v47 = vmul.f32 0.2, %v271_v43  ;;  %vm274_vm4 = vcmp.gt.f32.partialorder %v270_v44, 0.0  ;;  %v278_v48 = vmul.f32 0.2, %v270_v44 }
 0x1be   :  { %v280_v51 = vmul.f32 0.2, %v272_v45  ;;  %v281_v53 = vmul.f32 0.2, %v273_v46  ;;  %vm276_vm6 = vcmp.gt.f32.partialorder %v272_v45, 0.0  ;;  %vm277_vm7 = vcmp.gt.f32.partialorder %v273_v46, 0.0 }
 0x1bf   :  { %v283_v49 = vsel %vm275_vm3, %v271_v43, %v279_v47  ;;  %v282_v50 = vsel %vm274_vm4, %v270_v44, %v278_v48  ;;  %v716_v44 = vld [vmem:[#allocation9 + $0x1] ss:$0 sm:$0xff]  ;;  %v717_v47 = vld [vmem:[#allocation9 + $0x2] ss:$0 sm:$0xff] }
 0x1c0   :  { %v295_v55 = vsel %vm291_vm1, %v283_v49, -1e+30  ;;  %v294_v56 = vsel %vm290_vm2, %v282_v50, -1e+30  ;;  %v284_v59 = vsel %vm276_vm6, %v272_v45, %v280_v51  ;;  %v285_v60 = vsel %vm277_vm7, %v273_v46, %v281_v53  ;;  %v718_v50 = vld [vmem:[#allocation9 + $0x3] ss:$0 sm:$0xff] }
 0x1c1   :  { %v302_v57 = vsel %vm298_vm5, %v295_v55, -inf  ;;  %v299_v58 = vsel %vm298_vm5, %v294_v56, -inf  ;;  %v296_v61 = vsel %vm292_vm8, %v284_v59, -1e+30  ;;  %v297_v62 = vsel %vm293_vm9, %v285_v60, -1e+30 }
 0x1c2   :  { %303 = vmax.xlane.f32.xlu0 %v302_v57  ;;  %300 = vmax.xlane.f32.xlu1 %v299_v58  ;;  %v305_v63 = vsel %vm298_vm5, %v296_v61, -inf  ;;  %v308_v0 = vsel %vm298_vm5, %v297_v62, -inf }
 0x1ca   :  { %306 = vmax.xlane.f32.xlu1 %v305_v63  ;;  %309 = vmax.xlane.f32.xlu0 %v308_v0 }
 0x235   :  { %v304_v1 = vpop.xlane.xlu0 %303  ;;  %v301_v2 = vpop.xlane.xlu1 %300 }
 0x236   :  { %v312_v3 = vsub.f32 %v295_v55, %v304_v1  ;;  %v311_v4 = vsub.f32 %v294_v56, %v301_v2 }
 0x238   :  { %v317_v5 = vmul.f32 1.442695, %v312_v3  ;;  %v315_v6 = vmul.f32 1.442695, %v311_v4 }
 0x23a   :  { %719 = vpow2.f32 %v317_v5 }
 0x23b   :  { %721 = vpow2.f32 %v315_v6 }
 0x23d   :  { %v310_v8 = vpop.xlane.xlu0 %309  ;;  %v307_v9 = vpop.xlane.xlu1 %306 }
 0x23e   :  { %v314_v10 = vsub.f32 %v297_v62, %v310_v8  ;;  %v313_v11 = vsub.f32 %v296_v61, %v307_v9 }
 0x240   :  { %v720_v13 = vpop.eup %719  ;;  %v321_v14 = vmul.f32 1.442695, %v314_v10  ;;  %v319_v15 = vmul.f32 1.442695, %v313_v11 }
 0x241   :  { %v722_v16 = vpop.eup %721  ;;  %v326_v17 = vsel %vm298_vm5, %v720_v13, 0.0 }
 0x242   :  { %723 = vpow2.f32 %v321_v14  ;;  %327 = vadd.xlane.f32.xlu2 %v326_v17  ;;  %v323_v18 = vsel %vm298_vm5, %v722_v16, 0.0 }
 0x243   :  { %725 = vpow2.f32 %v319_v15  ;;  %324 = vadd.xlane.f32.xlu1 %v323_v18 }
 0x248   :  { %v724_v21 = vpop.eup %723 }
 0x249   :  { %v726_v23 = vpop.eup %725  ;;  %v332_v24 = vsel %vm298_vm5, %v724_v21, 0.0 }
 0x24a   :  { %v329_v25 = vsel %vm298_vm5, %v726_v23, 0.0 }
 0x24b   :  { %333 = vadd.xlane.f32.xlu1 %v332_v24  ;;  %330 = vadd.xlane.f32.xlu0 %v329_v25 }
 0x2b5   :  { %v328_v27 = vpop.xlane.xlu2 %327 }
 0x2b6   :  { %727 = vrcp.f32 %v328_v27  ;;  %v325_v28 = vpop.xlane.xlu1 %324 }
 0x2b7   :  { %729 = vrcp.f32 %v325_v28 }
 0x2bc   :  { %v728_v29 = vpop.eup %727 }
 0x2bd   :  { %v730_v30 = vpop.eup %729  ;;  %v340_v31 = vmul.f32 %v728_v29, %v720_v13 }
 0x2be   :  { %v339_v32 = vmul.f32 %v730_v30, %v722_v16  ;;  %v331_v33 = vpop.xlane.xlu0 %330  ;;  %v334_v34 = vpop.xlane.xlu1 %333 }
 0x2bf   :  { %731 = vrcp.f32 %v331_v33 }
 0x2c0   :  { %v343_v35 = vpack.c.bf16 %v340_v31, %v339_v32  ;;  %733 = vrcp.f32 %v334_v34 }
 0x2c2   :  { %670 = vmatmul.msk.bf16.vlgmr.msra.gmra.mxu2 %vm298_vm5, %v343_v35 }
 0x2c5   :  { %v732_v36 = vpop.eup %731 }
 0x2c6   :  { %v734_v37 = vpop.eup %733  ;;  %v341_v38 = vmul.f32 %v732_v36, %v726_v23 }
 0x2c7   :  { %v342_v39 = vmul.f32 %v734_v37, %v724_v21 }
 0x2c9   :  { %v344_v40 = vpack.c.bf16 %v342_v39, %v341_v38 }
 0x2d2   :  { %671 = vmatmul.msk.bf16.gmra.mxu2 %vm298_vm5, %v344_v40 }
 0x345   :  { %v972_v42 = vpop.f32.mrf.mxu2 }
 0x346   :  { %v388_v43 = vmul.f32 %v715_v41, %v972_v42 }
 0x348   :  { %392 = vadd.xlane.f32.xlu0 %v388_v43 }
 0x34d   :  { %v975_v45 = vpop.f32.mrf.mxu2 }
 0x34e   :  { %v389_v46 = vmul.f32 %v716_v44, %v975_v45 }
 0x350   :  { %394 = vadd.xlane.f32.xlu1 %v389_v46 }
 0x355   :  { %v978_v48 = vpop.f32.mrf.mxu2 }
 0x356   :  { %v390_v49 = vmul.f32 %v717_v47, %v978_v48 }
 0x358   :  { %396 = vadd.xlane.f32.xlu0 %v390_v49 }
 0x35d   :  { %v981_v51 = vpop.f32.mrf.mxu2 }
 0x35e   :  { %v391_v52 = vmul.f32 %v718_v50, %v981_v51 }
 0x360   :  { %398 = vadd.xlane.f32.xlu1 %v391_v52  ;;  %v500_v52 = vlaneseq }
 0x3bb   :  { %v393_v53 = vpop.xlane.xlu0 %392 }
 0x3bc   :  { %v400_v54 = vmul.f32 0.088388346, %v393_v53 }
 0x3be   :  { %v404_v55 = vrot.slane %v400_v54, 4 }
 0x3c0   :  { %v405_v56 = vmax.f32 %v400_v54, %v404_v55 }
 0x3c2   :  { %v406_v57 = vrot.slane %v405_v56, 2 }
 0x3c3   :  { %v395_v58 = vpop.xlane.xlu1 %394 }
 0x3c4   :  { %v407_v59 = vmax.f32 %v405_v56, %v406_v57  ;;  %v401_v60 = vmul.f32 0.088388346, %v395_v58  ;;  %v1001_v58 = vshrl.u32 %v500_v52, 7 }
 0x3c6   :  { %v408_v61 = vrot.slane %v407_v59, 1  ;;  %v410_v62 = vrot.slane %v401_v60, 4 }
 0x3c8   :  { %v409_v63 = vmax.f32 %v407_v59, %v408_v61  ;;  %v411_v0 = vmax.f32 %v401_v60, %v410_v62 }
 0x3ca   :  { %v428_v1 = vsub.f32 %v400_v54, %v409_v63  ;;  %v412_v2 = vrot.slane %v411_v0, 2 }
 0x3cb   :  { %v397_v3 = vpop.xlane.xlu0 %396 }
 0x3cc   :  { %v432_v4 = vmul.f32 1.442695, %v428_v1  ;;  %v413_v5 = vmax.f32 %v411_v0, %v412_v2  ;;  %v402_v6 = vmul.f32 0.088388346, %v397_v3  ;;  %v506_v0 = vstv %s987_s20 }
 0x3cd   :  { %v509_v1 = vstv %s992_s22  ;;  %vm1015_vm10 = vcmp.ge.s32.totalorder %v1001_v58, %v506_v0 }
 0x3ce   :  { %735 = vpow2.f32 %v432_v4  ;;  %v414_v7 = vrot.slane %v413_v5, 1  ;;  %v416_v8 = vrot.slane %v402_v6, 4  ;;  %v1009_v4 = vadd.s32 8, %v1001_v58 }
 0x3cf   :  { %vm1020_vm11 = vcmp.le.s32.totalorder %v1001_v58, %v509_v1 }
 0x3d0   :  { %v415_v9 = vmax.f32 %v413_v5, %v414_v7  ;;  %v417_v10 = vmax.f32 %v402_v6, %v416_v8  ;;  %vm1029_vm12 = vcmp.ge.s32.totalorder %v1009_v4, %v506_v0  ;;  %vm1034_vm13 = vcmp.le.s32.totalorder %v1009_v4, %v509_v1  ;;  %vm512_vm14 = vmand %vm1015_vm10, %vm1020_vm11 }
 0x3d1   :  { %vm513_vm2 = vmand %vm1029_vm12, %vm1034_vm13  ;;  %v589_v1 = vstv %s588_s0 }
 0x3d2   :  { %v429_v11 = vsub.f32 %v401_v60, %v415_v9  ;;  %v418_v12 = vrot.slane %v417_v10, 2  ;;  %v516_v9 = vstv %s515_s25 }
 0x3d3   :  { %v399_v13 = vpop.xlane.xlu1 %398  ;;  %vm1042_vm15 = vcmp.eq.s32.totalorder %v516_v9, 1 }
 0x3d4   :  { %v736_v14 = vpop.eup %735  ;;  %v434_v15 = vmul.f32 1.442695, %v429_v11  ;;  %v419_v16 = vmax.f32 %v417_v10, %v418_v12  ;;  %v403_v17 = vmul.f32 0.088388346, %v399_v13  ;;  %v529_v12 = vstv %s995_s23  ;;  %vm1084_vm5 = vmand %vm512_vm14, %vm1042_vm15 }
 0x3d5   :  { %v440_v18 = vrot.slane %v736_v14, 4  ;;  %v532_v13 = vstv %s997_s24  ;;  %vm1049_vm0 = vcmp.ge.s32.totalorder %v1001_v58, %v529_v12  ;;  %vm1065_vm3 = vcmp.ge.s32.totalorder %v1009_v4, %v529_v12  ;;  %vm1107_vm9 = vmand %vm513_vm2, %vm1042_vm15 }
 0x3d6   :  { %737 = vpow2.f32 %v434_v15  ;;  %v420_v19 = vrot.slane %v419_v16, 1  ;;  %v422_v20 = vrot.slane %v403_v17, 4  ;;  %vm1054_vm1 = vcmp.le.s32.totalorder %v1001_v58, %v532_v13 }
 0x3d7   :  { %v441_v21 = vadd.f32 %v736_v14, %v440_v18  ;;  %vm1070_vm4 = vcmp.le.s32.totalorder %v1009_v4, %v532_v13  ;;  %vm535_vm6 = vmand %vm1049_vm0, %vm1054_vm1 }
 0x3d8   :  { %v421_v22 = vmax.f32 %v419_v16, %v420_v19  ;;  %v423_v23 = vmax.f32 %v403_v17, %v422_v20  ;;  %vm536_vm8 = vmand %vm1065_vm3, %vm1070_vm4 }
 0x3d9   :  { %v442_v24 = vrot.slane %v441_v21, 2 }
 0x3da   :  { %v430_v25 = vsub.f32 %v402_v6, %v421_v22  ;;  %v424_v26 = vrot.slane %v423_v23, 2 }
 0x3db   :  { %v443_v27 = vadd.f32 %v442_v24, %v441_v21  ;;  %v539_v21 = vstv %s538_s29 }
 0x3dc   :  { %v738_v28 = vpop.eup %737  ;;  %v436_v29 = vmul.f32 1.442695, %v430_v25  ;;  %v425_v30 = vmax.f32 %v423_v23, %v424_v26  ;;  %vm540_vm7 = vcmp.eq.s32.totalorder %v539_v21, 1 }
 0x3dd   :  { %v444_v31 = vrot.slane %v443_v27, 1  ;;  %v446_v32 = vrot.slane %v738_v28, 4  ;;  %vm541_vm10 = vmand %vm535_vm6, %vm540_vm7 }
 0x3de   :  { %739 = vpow2.f32 %v436_v29  ;;  %v426_v33 = vrot.slane %v425_v30, 1  ;;  %vm542_vm11 = vmand %vm536_vm8, %vm540_vm7 }
 0x3df   :  { %v445_v34 = vadd.f32 %v444_v31, %v443_v27  ;;  %v447_v35 = vadd.f32 %v738_v28, %v446_v32 }
 0x3e0   :  { %v427_v36 = vmax.f32 %v425_v30, %v426_v33 }
 0x3e1   :  { %741 = vrcp.f32 %v445_v34  ;;  %v448_v37 = vrot.slane %v447_v35, 2 }
 0x3e2   :  { %v431_v38 = vsub.f32 %v403_v17, %v427_v36 }
 0x3e3   :  { %v449_v39 = vadd.f32 %v448_v37, %v447_v35 }
 0x3e4   :  { %v984_v40 = vpop.eup %739  ;;  %v438_v41 = vmul.f32 1.442695, %v431_v38 }
 0x3e5   :  { %v450_v43 = vrot.slane %v449_v39, 1  ;;  %v452_v44 = vrot.slane %v984_v40, 4 }
 0x3e6   :  { %743 = vpow2.f32 %v438_v41  ;;  %v559_v41 = vstv %s1074_s6 }
 0x3e7   :  { %v742_v46 = vpop.eup %741  ;;  %v451_v47 = vadd.f32 %v450_v43, %v449_v39  ;;  %v453_v49 = vadd.f32 %v984_v40, %v452_v44  ;;  %vm1128_vm13 = vcmp.le.s32.totalorder %v1001_v58, %v559_v41  ;;  %vm1142_vm15 = vcmp.le.s32.totalorder %v1009_v4, %v559_v41 }
 0x3e8   :  { %v468_v50 = vmul.f32 %v742_v46, %v736_v14 }
 0x3e9   :  { %745 = vrcp.f32 %v451_v47  ;;  %v454_v53 = vrot.slane %v453_v49, 2 }
 0x3ea   :  { %v472_v54 = vmul.f32 %v468_v50, %v972_v42 }
 0x3eb   :  { %v455_v55 = vadd.f32 %v454_v53, %v453_v49 }
 0x3ec   :  { %v999_v56 = vpop.eup %743  ;;  %v476_v57 = vrot.slane %v472_v54, 4 }
 0x3ed   :  { %v456_v59 = vrot.slane %v455_v55, 1  ;;  %v458_v60 = vrot.slane %v999_v56, 4 }
 0x3ee   :  { %v477_v61 = vadd.f32 %v476_v57, %v472_v54  ;;  %v582_v57 = vstv %s1111_s8 }
 0x3ef   :  { %v746_v62 = vpop.eup %745  ;;  %v457_v42 = vadd.f32 %v456_v59, %v455_v55  ;;  %v459_v63 = vadd.f32 %v999_v56, %v458_v60  ;;  %v566_v55 = vstv %s565_s9  ;;  %vm1160_vm3 = vcmp.le.s32.totalorder %v1001_v58, %v582_v57 }
 0x3f0   :  { %v469_v2 = vmul.f32 %v746_v62, %v738_v28  ;;  %v478_v3 = vrot.slane %v477_v61, 2  ;;  %vm1150_vm1 = vcmp.eq.s32.totalorder %v566_v55, 1  ;;  %vm584_vm6 = vcmp.le.s32.totalorder %v1009_v4, %v582_v57 }
 0x3f1   :  { %747 = vrcp.f32 %v457_v42  ;;  %v460_v5 = vrot.slane %v459_v63, 2 }
 0x3f2   :  { %v473_v6 = vmul.f32 %v469_v2, %v975_v45  ;;  %v479_v11 = vadd.f32 %v478_v3, %v477_v61 }
 0x3f3   :  { %v461_v10 = vadd.f32 %v460_v5, %v459_v63 }
 0x3f4   :  { %v482_v14 = vrot.slane %v473_v6, 4  ;;  %v480_v24 = vrot.slane %v479_v11, 1 }
 0x3f5   :  { %v462_v16 = vrot.slane %v461_v10, 1 }
 0x3f6   :  { %v483_v18 = vadd.f32 %v482_v14, %v473_v6  ;;  %v481_v32 = vadd.f32 %v480_v24, %v479_v11 }
 0x3f7   :  { %v748_v22 = vpop.eup %747  ;;  %v463_v23 = vadd.f32 %v462_v16, %v461_v10 }
 0x3f8   :  { %v470_v27 = vmul.f32 %v748_v22, %v984_v40  ;;  %v484_v28 = vrot.slane %v483_v18, 2  ;;  %v524_v38 = vsel %vm1084_vm5, %v481_v32, 0.0  ;;  %v525_v39 = vsel %vm1107_vm9, %v481_v32, 0.0 }
 0x3f9   :  { %749 = vrcp.f32 %v463_v23  ;;  %v556_v40 = vstv %s1046_s2  ;;  %vm590_vm9 = vcmp.eq.s32.totalorder %v589_v1, 1 }
 0x3fa   :  { %v474_v30 = vmul.f32 %v470_v27, %v978_v48  ;;  %v485_v31 = vadd.f32 %v484_v28, %v483_v18  ;;  %vm1123_vm12 = vcmp.ge.s32.totalorder %v1001_v58, %v556_v40  ;;  %vm1137_vm14 = vcmp.ge.s32.totalorder %v1009_v4, %v556_v40 }
 0x3fb   :  { %vm562_vm0 = vmand %vm1123_vm12, %vm1128_vm13 }
 0x3fc   :  { %v486_v33 = vrot.slane %v485_v31, 1  ;;  %v488_v34 = vrot.slane %v474_v30, 4  ;;  %vm563_vm4 = vmand %vm1137_vm14, %vm1142_vm15 }
 0x3fd   :  { %vm1172_vm7 = vmand %vm562_vm0, %vm1150_vm1 }
 0x3fe   :  { %v487_v35 = vadd.f32 %v486_v33, %v485_v31  ;;  %v489_v36 = vadd.f32 %v488_v34, %v474_v30 }
 0x3ff   :  { %v750_v37 = vpop.eup %749 }
 0x400   :  { %v471_v43 = vmul.f32 %v750_v37, %v999_v56  ;;  %v490_v44 = vrot.slane %v489_v36, 2  ;;  %v547_v46 = vsel %vm541_vm10, %v487_v35, 0.0  ;;  %v548_v47 = vsel %vm542_vm11, %v487_v35, 0.0  ;;  %vm569_vm11 = vmand %vm563_vm4, %vm1150_vm1 }
 0x401   :  { %v549_v49 = vadd.f32 %v547_v46, %v524_v38  ;;  %v550_v50 = vadd.f32 %v548_v47, %v525_v39  ;;  %v579_v56 = vstv %s1098_s7 }
 0x402   :  { %v475_v52 = vmul.f32 %v471_v43, %v981_v51  ;;  %v491_v59 = vadd.f32 %v490_v44, %v489_v36  ;;  %vm1155_vm2 = vcmp.ge.s32.totalorder %v1001_v58, %v579_v56  ;;  %vm581_vm5 = vcmp.ge.s32.totalorder %v1009_v4, %v579_v56 }
 0x403   :  { %551 = vst [vmem:[#allocation12] sm:$0xff] %v549_v49  ;;  %vm585_vm8 = vmand %vm1155_vm2, %vm1160_vm3 }
 0x404   :  { %v494_v60 = vrot.slane %v475_v52, 4  ;;  %552 = vst [vmem:[#allocation12 + $0x8] sm:$0xff] %v550_v50  ;;  %v492_v2 = vrot.slane %v491_v59, 1  ;;  %vm586_vm10 = vmand %vm581_vm5, %vm584_vm6 }
 0x405   :  { %vm591_vm12 = vmand %vm585_vm8, %vm590_vm9 }
 0x406   :  { %v495_v42 = vadd.f32 %v494_v60, %v475_v52  ;;  %v493_v4 = vadd.f32 %v492_v2, %v491_v59  ;;  %vm592_vm13 = vmand %vm586_vm10, %vm590_vm9 }
 0x408   :  { %v496_v3 = vrot.slane %v495_v42, 2  ;;  %v574_v8 = vsel %vm1172_vm7, %v493_v4, 0.0  ;;  %v575_v9 = vsel %vm569_vm11, %v493_v4, 0.0 }
 0x40a   :  { %v497_v58 = vadd.f32 %v496_v3, %v495_v42 }
 0x40c   :  { %v498_v6 = vrot.slane %v497_v58, 1 }
 0x40e   :  { %v499_v7 = vadd.f32 %v498_v6, %v497_v58 }
 0x410   :  { %v597_v10 = vsel %vm591_vm12, %v499_v7, 0.0  ;;  %v598_v11 = vsel %vm592_vm13, %v499_v7, 0.0 }
 0x411   :  { %v599_v12 = vadd.f32 %v597_v10, %v574_v8  ;;  %v600_v13 = vadd.f32 %v598_v11, %v575_v9 }
 0x413   :  { %602 = vst [vmem:[#allocation12 + $0x10] sm:$0xff] %v599_v12 }
 0x414   :  { %603 = vst [vmem:[#allocation12 + $0x18] sm:$0xff] %v600_v13 }
 0x415   :  { %616 = dma.vmem_to_hbm [thread:$0]  %s609_s11, 512, %s611_s14, [#allocation4], %s894_s26, %s894_s26, %s895_s27  }
 0x416   :  { %891 = dma.done.wait [#allocation4], 512  }
 0x417   :  { %892 = vsyncadd [#allocation4], 4294966784 }
 0x418   :  { %621 = vsyncpa [#allocation3], 1 }
 0x419   :  { %622 = vsyncpa [#allocation8], 1 }
 0x41a   :  { %623 = vsyncpa [#allocation11], 1 }
 0x41b   :  { %624 = vsyncpa [#allocation4], 1 }
 0x41c   :  { %625 = vsyncpa [#allocation5], 1 }

</bundles_post_ra>
